<compile_context>
chip_gen: v5e
topology: v5e:2x2
jax: 0.10.0
libtpu: 0.0.40
codegen_flags: <defaults>
</compile_context>

<pallas_src>
import functools

import jax
import jax.numpy as jnp
from jax.experimental import pallas as pl
from jax.experimental.pallas import tpu as pltpu


# ---------------------------------------------------------------------------
# Kernels
# ---------------------------------------------------------------------------

def _se_block_kernel(x_ref, w1_ref, b1_ref, w2_ref, b2_ref, o_ref, *, inv_hw):
    """Single-pass SE: pool + MLP gate + scale on a (Nb, C, HW) block."""
    x = x_ref[...]                                                     # (Nb, C, HW)

    # Global average pool over the (logical, possibly non-128-multiple) HW
    # extent; Mosaic masks the padded lane group. Accumulate in f32 without
    # materializing an f32 copy of the slab.
    # TODO(synk): if a bundle dump on v7x/bf16 ever shows VALU saturated, move
    # this reduction onto the MXU via lax.dot_general against a ones vector.
    emb = jnp.sum(x, axis=-1, dtype=jnp.float32) * inv_hw              # (Nb, C)

    # fc1 = ReLU(emb @ W1^T + b1)
    hid = jnp.dot(emb, w1_ref[...], preferred_element_type=jnp.float32) + b1_ref[...]
    hid = jnp.maximum(hid, 0.0)                                        # (Nb, Cr)

    # fc2 = sigmoid(hid @ W2^T + b2)
    g = jnp.dot(hid, w2_ref[...], preferred_element_type=jnp.float32) + b2_ref[...]
    g = jax.nn.sigmoid(g)                                              # (Nb, C)

    # Scale with the f32 gate; cast the product on store (matches the f32
    # reference more closely than casting the gate first for bf16 inputs).
    o_ref[...] = (x * g[:, :, None]).astype(o_ref.dtype)


def _se_pool_gate_kernel(x_ref, w1_ref, b1_ref, w2_ref, b2_ref, gate_ref,
                         acc_ref, *, inv_hw, hw, thw):
    """Two-pass, pass 1: tiled pooled-sum accumulation + gate at the last tile."""
    h_idx = pl.program_id(1)

    @pl.when(h_idx == 0)
    def _():
        acc_ref[...] = jnp.zeros_like(acc_ref)

    # The HW tile size is a multiple of 128, so the last tile may extend past
    # the true HW extent; mask those lanes out of the pooled sum.
    lane = jax.lax.broadcasted_iota(jnp.int32, x_ref.shape, 2)
    valid = (h_idx * thw + lane) < hw
    xf = jnp.where(valid, x_ref[...].astype(jnp.float32), 0.0)
    acc_ref[...] += jnp.sum(xf, axis=-1)                               # (Nb, C)

    @pl.when(h_idx == pl.num_programs(1) - 1)
    def _():
        emb = acc_ref[...] * inv_hw                                    # (Nb, C)
        hid = jnp.dot(emb, w1_ref[...], preferred_element_type=jnp.float32) + b1_ref[...]
        hid = jnp.maximum(hid, 0.0)
        g = jnp.dot(hid, w2_ref[...], preferred_element_type=jnp.float32) + b2_ref[...]
        gate_ref[...] = jax.nn.sigmoid(g)[:, :, None]                  # (Nb, C, 1)


def _se_scale_kernel(x_ref, gate_ref, o_ref):
    """Two-pass, pass 2: apply the channel-wise gate to an HW tile."""
    o_ref[...] = (x_ref[...] * gate_ref[...]).astype(o_ref.dtype)


# ---------------------------------------------------------------------------
# Sizing helpers
# ---------------------------------------------------------------------------

def _vmem_params():
    """(block budget for the 4x block footprint, vmem_limit clamp), per chip."""
    try:
        phys = int(pltpu.get_tpu_info().vmem_capacity_bytes)
    except Exception:
        phys = 64 << 20  # conservative fallback (v7x per-TC VMEM)
    cap = max(16 << 20, phys - (8 << 20))        # never request above physical
    budget = min(int(phys * 0.65), cap - (4 << 20))
    return budget, cap


def _clamp_vmem_limit(requested, cap):
    return int(min(max(requested, 16 << 20), cap))


def _choose_batch_block(n, per_elem_bytes, vmem_budget):
    """Batch elements per grid step (cdiv grid; ragged last block allowed)."""
    max_nb = max(1, vmem_budget // (4 * per_elem_bytes))
    nb = min(n, max_nb)
    grid = -(-n // nb)
    # Equalize block sizes across the chosen grid length (avoid a tiny tail).
    nb = -(-n // grid)
    # Prefer an even grid length (balanced across v7x's two TensorCores) when
    # blocks stay MiB-scale; essentially free on single-TC v5e/v6e.
    if grid % 2 == 1 and n > 1:
        nb2 = -(-n // (grid + 1))
        if nb2 >= 1 and nb2 * per_elem_bytes >= (1 << 20):
            nb = nb2
    return nb


def _choose_two_pass_tiles(n, c, hw, itemsize, vmem_budget):
    """(Nb, THW) for the two-pass path. THW is a multiple of 128."""
    block_budget = max(1, vmem_budget // 4)
    hw_padded = -(-hw // 128) * 128
    thw = (block_budget // (c * itemsize)) // 128 * 128
    thw = max(128, min(hw_padded, thw))
    nb = max(1, block_budget // (c * thw * itemsize))
    nb = min(nb, n)
    # TODO(synk): if C alone is so large that a single (1, C, 128) tile exceeds
    # the budget, the channel dim would need tiling as well.
    return nb, thw


# ---------------------------------------------------------------------------
# Wrapper
# ---------------------------------------------------------------------------

def se_block(x, w1, b1, w2, b2, *, force_two_pass=False, vmem_budget_bytes=None):
    """SEBlock forward. x: (N, C, H, W). w1: (Cr, C), b1: (Cr,), w2: (C, Cr), b2: (C,)."""
    N, C, H, W = x.shape
    Cr = w1.shape[0]
    HW = H * W
    itemsize = x.dtype.itemsize

    budget, cap = _vmem_params()
    if vmem_budget_bytes is not None:       # test hook / manual override
        budget = int(vmem_budget_bytes)

    # Layout-preserving reshape (free in XLA): HW becomes the lane axis.
    x_flat = x.reshape(N, C, HW)

    w1t = jnp.asarray(w1.T, dtype=jnp.float32)           # (C, Cr)
    w2t = jnp.asarray(w2.T, dtype=jnp.float32)           # (Cr, C)
    b1_2d = jnp.asarray(b1, dtype=jnp.float32).reshape(1, Cr)
    b2_2d = jnp.asarray(b2, dtype=jnp.float32).reshape(1, C)

    per_elem_bytes = C * HW * itemsize
    weight_bytes = (w1t.size + b1_2d.size + w2t.size + b2_2d.size) * 4
    two_pass = force_two_pass or (4 * per_elem_bytes > budget)

    if not two_pass:
        Nb = _choose_batch_block(N, per_elem_bytes, budget)
        grid = (pl.cdiv(N, Nb),)
        block_bytes = Nb * per_elem_bytes
        vmem_limit = _clamp_vmem_limit(
            4 * block_bytes + 2 * weight_bytes + (2 << 20), cap)

        kernel = functools.partial(_se_block_kernel, inv_hw=1.0 / HW)
        # NOTE: input stays depth-2 buffered; only add pl.Buffered(3) if xprof
        # shows exposed DMA at grid-step boundaries (tight VMEM on v7x).
        out_flat = pl.pallas_call(
            kernel,
            out_shape=jax.ShapeDtypeStruct((N, C, HW), x.dtype),
            grid_spec=pltpu.PrefetchScalarGridSpec(
                num_scalar_prefetch=0,
                grid=grid,
                in_specs=[
                    pl.BlockSpec((Nb, C, HW), lambda n: (n, 0, 0)),   # x slab
                    pl.BlockSpec((C, Cr), lambda n: (0, 0)),          # w1^T
                    pl.BlockSpec((1, Cr), lambda n: (0, 0)),          # b1
                    pl.BlockSpec((Cr, C), lambda n: (0, 0)),          # w2^T
                    pl.BlockSpec((1, C), lambda n: (0, 0)),           # b2
                ],
                out_specs=pl.BlockSpec((Nb, C, HW), lambda n: (n, 0, 0)),
            ),
            compiler_params=pltpu.CompilerParams(
                dimension_semantics=("parallel",),
                vmem_limit_bytes=vmem_limit,
            ),
        )(x_flat, w1t, b1_2d, w2t, b2_2d)
    else:
        Nb, THW = _choose_two_pass_tiles(N, C, HW, itemsize, budget)
        n_blocks = pl.cdiv(N, Nb)
        hw_tiles = pl.cdiv(HW, THW)
        block_bytes = Nb * C * THW * itemsize
        vmem_limit = _clamp_vmem_limit(
            4 * block_bytes + 2 * weight_bytes + (2 << 20), cap)

        pool_kernel = functools.partial(
            _se_pool_gate_kernel, inv_hw=1.0 / HW, hw=HW, thw=THW)

        gate = pl.pallas_call(
            pool_kernel,
            out_shape=jax.ShapeDtypeStruct((N, C, 1), jnp.float32),
            grid_spec=pltpu.PrefetchScalarGridSpec(
                num_scalar_prefetch=0,
                grid=(n_blocks, hw_tiles),
                in_specs=[
                    pl.BlockSpec((Nb, C, THW), lambda n, h: (n, 0, h)),
                    pl.BlockSpec((C, Cr), lambda n, h: (0, 0)),
                    pl.BlockSpec((1, Cr), lambda n, h: (0, 0)),
                    pl.BlockSpec((Cr, C), lambda n, h: (0, 0)),
                    pl.BlockSpec((1, C), lambda n, h: (0, 0)),
                ],
                out_specs=pl.BlockSpec((Nb, C, 1), lambda n, h: (n, 0, 0)),
                scratch_shapes=[pltpu.VMEM((Nb, C), jnp.float32)],
            ),
            compiler_params=pltpu.CompilerParams(
                dimension_semantics=("parallel", "arbitrary"),
                vmem_limit_bytes=vmem_limit,
            ),
        )(x_flat, w1t, b1_2d, w2t, b2_2d)

        out_flat = pl.pallas_call(
            _se_scale_kernel,
            out_shape=jax.ShapeDtypeStruct((N, C, HW), x.dtype),
            grid_spec=pltpu.PrefetchScalarGridSpec(
                num_scalar_prefetch=0,
                grid=(n_blocks, hw_tiles),
                in_specs=[
                    pl.BlockSpec((Nb, C, THW), lambda n, h: (n, 0, h)),
                    pl.BlockSpec((Nb, C, 1), lambda n, h: (n, 0, 0)),
                ],
                out_specs=pl.BlockSpec((Nb, C, THW), lambda n, h: (n, 0, h)),
            ),
            compiler_params=pltpu.CompilerParams(
                dimension_semantics=("parallel", "parallel"),
                vmem_limit_bytes=vmem_limit,
            ),
        )(x_flat, gate)

    return out_flat.reshape(N, C, H, W)


def se_block_reference(x, w1, b1, w2, b2):
    emb = x.mean(axis=(2, 3))                                   # (N, C)
    h = jnp.maximum(emb @ w1.T + b1, 0.0)                       # (N, Cr)
    g = jax.nn.sigmoid(h @ w2.T + b2)                           # (N, C)
    return x * g[:, :, None, None]


if __name__ == "__main__":
    # Config consistent with SEBlock(in_channels=8, reduction=4).
    N, C, H, W = 2, 8, 16, 16
    reduction = 4
    Cr = C // reduction

    key = jax.random.PRNGKey(0)
    kx, kw1, kb1, kw2, kb2 = jax.random.split(key, 5)

    x = jax.random.normal(kx, (N, C, H, W), dtype=jnp.float32)
    # nn.Linear(in_channels, in_channels // reduction): weight (Cr, C), bias (Cr,)
    w1 = jax.random.normal(kw1, (Cr, C), dtype=jnp.float32) * 0.1
    b1 = jax.random.normal(kb1, (Cr,), dtype=jnp.float32) * 0.1
    # nn.Linear(in_channels // reduction, in_channels): weight (C, Cr), bias (C,)
    w2 = jax.random.normal(kw2, (C, Cr), dtype=jnp.float32) * 0.1
    b2 = jax.random.normal(kb2, (C,), dtype=jnp.float32) * 0.1

    # 1) Default single-pass path.
    out = jax.block_until_ready(se_block(x, w1, b1, w2, b2))
    ref = se_block_reference(x, w1, b1, w2, b2)
    assert out.shape == (N, C, H, W)
    assert jnp.allclose(out, ref, atol=1e-5, rtol=1e-5), "single-pass mismatch"

    # 2) Non-128-multiple spatial extent (7x7 -> HW=49): validates the masked
    #    lane-group reduction/store on the unpadded HW block.
    x7 = jax.random.normal(kx, (3, C, 7, 7), dtype=jnp.float32)
    ref7 = se_block_reference(x7, w1, b1, w2, b2)
    out7 = jax.block_until_ready(se_block(x7, w1, b1, w2, b2))
    assert jnp.allclose(out7, ref7, atol=1e-5, rtol=1e-5), "unpadded-HW mismatch"

    # 3) Ragged cdiv batch grid (N=3 split into blocks of 2) on the single-pass path.
    out_r = jax.block_until_ready(
        se_block(x7, w1, b1, w2, b2, vmem_budget_bytes=16 * 1024))
    assert jnp.allclose(out_r, ref7, atol=1e-5, rtol=1e-5), "ragged-batch mismatch"

    # 4) Two-pass path, ragged batch block + masked partial HW tile.
    out_t = jax.block_until_ready(
        se_block(x7, w1, b1, w2, b2, force_two_pass=True,
                 vmem_budget_bytes=32 * 1024))
    assert jnp.allclose(out_t, ref7, atol=1e-5, rtol=1e-5), "two-pass mismatch"

    # 5) Two-pass path with multiple HW tiles (exercises the accumulation loop).
    out_m = jax.block_until_ready(
        se_block(x, w1, b1, w2, b2, force_two_pass=True,
                 vmem_budget_bytes=16 * 1024))
    assert jnp.allclose(out_m, ref, atol=1e-5, rtol=1e-5), "two-pass multi-tile mismatch"

    print("KERNEL_OK")
</pallas_src>

<mosaic_0001>
module attributes {stable_mosaic.version = 11 : i64} {
  func.func @_se_block_kernel(%arg0: i32, %arg1: memref<2x8x256xf32, #tpu.memory_space<vmem>>, %arg2: memref<8x2xf32, #tpu.memory_space<vmem>>, %arg3: memref<1x2xf32, #tpu.memory_space<vmem>>, %arg4: memref<2x8xf32, #tpu.memory_space<vmem>>, %arg5: memref<1x8xf32, #tpu.memory_space<vmem>>, %arg6: memref<2x8x256xf32, #tpu.memory_space<vmem>>) attributes {dimension_semantics = [#tpu.dimension_semantics<parallel>], iteration_bounds = array<i64: 1>, scalar_prefetch = 0 : i64, scratch_operands = 0 : i64, tpu.core_type = #tpu.core_type<tc>, window_params = [{transform_indices = @transform_0, window_bounds = array<i64: 2, 8, 256>}, {pipeline_mode = #tpu.pipeline_mode<synchronous>, transform_indices = @transform_1, window_bounds = array<i64: 8, 2>}, {pipeline_mode = #tpu.pipeline_mode<synchronous>, transform_indices = @transform_2, window_bounds = array<i64: 1, 2>}, {pipeline_mode = #tpu.pipeline_mode<synchronous>, transform_indices = @transform_3, window_bounds = array<i64: 2, 8>}, {pipeline_mode = #tpu.pipeline_mode<synchronous>, transform_indices = @transform_4, window_bounds = array<i64: 1, 8>}, {transform_indices = @transform_5, window_bounds = array<i64: 2, 8, 256>}]} {
    %c0 = arith.constant 0 : index
    %c0_0 = arith.constant 0 : index
    %c0_1 = arith.constant 0 : index
    %0 = vector.load %arg1[%c0, %c0_0, %c0_1] : memref<2x8x256xf32, #tpu.memory_space<vmem>>, vector<2x8x256xf32>
    %cst = arith.constant dense<0.000000e+00> : vector<2x8xf32>
    %1 = vector.multi_reduction <add>, %0, %cst [2] : vector<2x8x256xf32> to vector<2x8xf32>
    %cst_2 = arith.constant 3.906250e-03 : f32
    %2 = vector.broadcast %cst_2 : f32 to vector<2x8xf32>
    %3 = arith.mulf %1, %2 : vector<2x8xf32>
    %c0_3 = arith.constant 0 : index
    %c0_4 = arith.constant 0 : index
    %4 = vector.load %arg2[%c0_3, %c0_4] : memref<8x2xf32, #tpu.memory_space<vmem>>, vector<8x2xf32>
    %cst_5 = arith.constant dense<0.000000e+00> : vector<2x2xf32>
    %5 = tpu.matmul %3, %4, %cst_5 {dimension_numbers = #tpu.dot_dimension_numbers<[1], [0], [0], [1], [0, 0, 1, 1], [], []>} : vector<2x8xf32>, vector<8x2xf32>, vector<2x2xf32> -> vector<2x2xf32>
    %c0_6 = arith.constant 0 : index
    %c0_7 = arith.constant 0 : index
    %6 = vector.load %arg3[%c0_6, %c0_7] : memref<1x2xf32, #tpu.memory_space<vmem>>, vector<1x2xf32>
    %7 = vector.broadcast %6 : vector<1x2xf32> to vector<2x2xf32>
    %8 = arith.addf %5, %7 : vector<2x2xf32>
    %cst_8 = arith.constant 0.000000e+00 : f32
    %9 = vector.broadcast %cst_8 : f32 to vector<2x2xf32>
    %10 = arith.maximumf %8, %9 : vector<2x2xf32>
    %c0_9 = arith.constant 0 : index
    %c0_10 = arith.constant 0 : index
    %11 = vector.load %arg4[%c0_9, %c0_10] : memref<2x8xf32, #tpu.memory_space<vmem>>, vector<2x8xf32>
    %cst_11 = arith.constant dense<0.000000e+00> : vector<2x8xf32>
    %12 = tpu.matmul %10, %11, %cst_11 {dimension_numbers = #tpu.dot_dimension_numbers<[1], [0], [0], [1], [0, 0, 1, 1], [], []>} : vector<2x2xf32>, vector<2x8xf32>, vector<2x8xf32> -> vector<2x8xf32>
    %c0_12 = arith.constant 0 : index
    %c0_13 = arith.constant 0 : index
    %13 = vector.load %arg5[%c0_12, %c0_13] : memref<1x8xf32, #tpu.memory_space<vmem>>, vector<1x8xf32>
    %14 = vector.broadcast %13 : vector<1x8xf32> to vector<2x8xf32>
    %15 = arith.addf %12, %14 : vector<2x8xf32>
    %16 = arith.negf %15 : vector<2x8xf32>
    %17 = math.exp %16 : vector<2x8xf32>
    %cst_14 = arith.constant 1.000000e+00 : f32
    %18 = vector.broadcast %cst_14 : f32 to vector<2x8xf32>
    %19 = arith.addf %18, %17 : vector<2x8xf32>
    %20 = arith.divf %18, %19 : vector<2x8xf32>
    %21 = vector.shape_cast %20 : vector<2x8xf32> to vector<2x8x1xf32>
    %22 = vector.broadcast %21 : vector<2x8x1xf32> to vector<2x8x256xf32>
    %23 = arith.mulf %0, %22 : vector<2x8x256xf32>
    %c0_15 = arith.constant 0 : index
    %c0_16 = arith.constant 0 : index
    %c0_17 = arith.constant 0 : index
    %24 = vector.load %arg6[%c0_15, %c0_16, %c0_17] : memref<2x8x256xf32, #tpu.memory_space<vmem>>, vector<2x8x256xf32>
    tpu.vector_store %arg6[%c0_15, %c0_16, %c0_17], %23 {strides = array<i32>} : memref<2x8x256xf32, #tpu.memory_space<vmem>>, vector<2x8x256xf32>,
    return
  }
  func.func @transform_0(%arg0: i32) -> (i32, i32, i32) {
    %c0_i32 = arith.constant 0 : i32
    %c0_i32_0 = arith.constant 0 : i32
    %c0_i32_1 = arith.constant 0 : i32
    return %arg0, %c0_i32, %c0_i32_0 : i32, i32, i32
  }
  func.func @transform_1(%arg0: i32) -> (i32, i32) {
    %c0_i32 = arith.constant 0 : i32
    %c0_i32_0 = arith.constant 0 : i32
    %c0_i32_1 = arith.constant 0 : i32
    return %c0_i32, %c0_i32_0 : i32, i32
  }
  func.func @transform_2(%arg0: i32) -> (i32, i32) {
    %c0_i32 = arith.constant 0 : i32
    %c0_i32_0 = arith.constant 0 : i32
    %c0_i32_1 = arith.constant 0 : i32
    return %c0_i32, %c0_i32_0 : i32, i32
  }
  func.func @transform_3(%arg0: i32) -> (i32, i32) {
    %c0_i32 = arith.constant 0 : i32
    %c0_i32_0 = arith.constant 0 : i32
    %c0_i32_1 = arith.constant 0 : i32
    return %c0_i32, %c0_i32_0 : i32, i32
  }
  func.func @transform_4(%arg0: i32) -> (i32, i32) {
    %c0_i32 = arith.constant 0 : i32
    %c0_i32_0 = arith.constant 0 : i32
    %c0_i32_1 = arith.constant 0 : i32
    return %c0_i32, %c0_i32_0 : i32, i32
  }
  func.func @transform_5(%arg0: i32) -> (i32, i32, i32) {
    %c0_i32 = arith.constant 0 : i32
    %c0_i32_0 = arith.constant 0 : i32
    %c0_i32_1 = arith.constant 0 : i32
    return %arg0, %c0_i32, %c0_i32_0 : i32, i32, i32
  }
}

</mosaic_0001>

<bundles_post_ra>
// kernel: tpu_custom_call.1
= control target key start
LH: loop header
LB: loop body
LE: loop exit
PB: predicated region body
PF: predicated region fallthrough
CT: control target
= control target key end

     0   :  { %10 = vsyncpa [#allocation3], 0  ;;  %s313_s0 = inlined_call_operand.hbm [shape: f32[2,8,256], index: 0, kind: input, shape index: {}]   ;;  %s314_s1 = inlined_call_operand.vmem [shape: f32[8,2], index: 1, kind: input, shape index: {}]   ;;  %s315_s2 = inlined_call_operand.vmem [shape: f32[1,2], index: 2, kind: input, shape index: {}]   ;;  %s316_s3 = inlined_call_operand.vmem [shape: f32[2,8], index: 3, kind: input, shape index: {}]   ;;  %s317_s4 = inlined_call_operand.vmem [shape: f32[1,8], index: 4, kind: input, shape index: {}]   ;;  %s318_s5 = inlined_call_operand.hbm [shape: f32[2,8,256], index: 5, kind: output, shape index: {}]  }
   0x1   :  { %11 = vsyncpa [#allocation4], 0  ;;  %s16_s20 = sshll.u32 %s313_s0, 4  ;;  %s247_s21 = smov [#allocation2]   ;;  %s17_s20 = int_to_ptr.hbm [resolvable:$true] %s16_s20 }
   0x2   :  { %s18_s22 = sshll.u32 %s247_s21, 4  ;;  %s248_s23 = smov 256   ;;  %s19_s22 = int_to_ptr.vmem [resolvable:$true] %s18_s22 }
   0x3   :  { %s249_s24 = smov 16  }
   0x4   :  { %24 = dma.hbm_to_vmem [thread:$0]  %s17_s20, 512, %s19_s22, [#allocation3], %s248_s23, %s248_s23, %s249_s24  }
   0x5   :  { %243 = dma.done.wait [#allocation3], 512  }
   0x6   :  { %244 = vsyncadd [#allocation3], 4294966784  ;;  %v37_v0 = vld [vmem:[#allocation2] sm:$0xff]  ;;  %v38_v1 = vld [vmem:[#allocation2 + $0x8] sm:$0xff]  ;;  %v56_v8 = vlaneseq  ;;  %vm60_vm0 = vcmask 1041409   ;;  %vm62_vm1 = vcmask 64512  }
   0x7   :  { %v41_v2 = vadd.f32 %v38_v1, %v37_v0  ;;  %v287_v3 = vld [vmem:[#allocation2 + $0x10] sm:$0xff]  ;;  %v289_v4 = vld [vmem:[#allocation2 + $0x18] sm:$0xff]  ;;  %v49_v6 = vld [vmem:[%s314_s1] sm:$0xff]  ;;  %vm95_vm2 = vcmask 1041408   ;;  %vm91_vm3 = vcmask 15360   ;;  %s166_s7 = sshll.u32 %s318_s5, 4  ;;  %s167_s7 = int_to_ptr.hbm [resolvable:$true] %s166_s7 }
   0x8   :  { %v44_v5 = vadd.f32 %v289_v4, %v287_v3  ;;  %80 = vmatpush.msra.mxu0 %v49_v6  ;;  %v57_v9 = vand.u32 127, %v56_v8  ;;  %v86_v16 = vld [vmem:[%s316_s3] sm:$0x3]  ;;  %v140_v21 = vshrl.u32 %v56_v8, 7 }
   0x9   :  { %42 = vadd.xlane.f32.xlu0 %v41_v2  ;;  %180 = vmatpush.msk.msra.mxu1 %vm95_vm2, %v86_v16  ;;  %v189_v17 = vld [vmem:[%s315_s2] ss:$0 sm:$0xff]  ;;  %s250_s2 = smov [#allocation5]  }
   0xa   :  { %187 = vset.pattern.permute.xlu1 %v140_v21  ;;  %188 = vset.pattern.permute.xlu0 %v140_v21  ;;  %v190_v22 = vld [vmem:[%s317_s4] ss:$0 sm:$0xff]  ;;  %s164_s3 = sshll.u32 %s250_s2, 4  ;;  %s165_s3 = int_to_ptr.vmem [resolvable:$true] %s164_s3 }
  0x11   :  { %45 = vadd.xlane.f32.xlu0 %v44_v5 }
  0x7c   :  { %v43_v7 = vpop.xlane.xlu0 %42 }
  0x7d   :  { %v47_v10 = vmul.f32 0.00390625, %v43_v7 }
  0x7f   :  { %v58_v13 = vperm.slane %v47_v10, %v57_v9 }
  0x84   :  { %v46_v11 = vpop.xlane.xlu0 %45 }
  0x85   :  { %v48_v12 = vmul.f32 0.00390625, %v46_v11 }
  0x87   :  { %v59_v14 = vperm.slane %v48_v12, %v57_v9 }
  0x89   :  { %v61_v15 = vsel %vm60_vm0, %v59_v14, %v58_v13 }
  0x8a   :  { %179 = vmatmul.msk.f32.vlgmr.msra.gmra.mxu0 %vm62_vm1, %v61_v15 }
 0x107   :  { %v82_v18 = vpop.f32.mrf.mxu0 }
 0x108   :  { %v83_v19 = vadd.f32 %v189_v17, %v82_v18 }
 0x10a   :  { %v85_v20 = vmax.f32 %v83_v19, 0.0 }
 0x10c   :  { %181 = vmatmul.msk.f32.vlgmr.msra.gmra.mxu1 %vm91_vm3, %v85_v20 }
 0x189   :  { %v116_v23 = vpop.f32.mrf.mxu1 }
 0x18a   :  { %v117_v24 = vadd.f32 %v190_v22, %v116_v23 }
 0x18c   :  { %v182_v25 = vmul.f32 -1.442695, %v117_v24 }
 0x18e   :  { %191 = vpow2.f32 %v182_v25 }
 0x194   :  { %v192_v26 = vpop.eup %191 }
 0x195   :  { %v122_v27 = vadd.f32 1.0, %v192_v26 }
 0x197   :  { %193 = vrcp.f32 %v122_v27  ;;  %v134_v31 = vand.u32 2147483648, %v122_v27  ;;  %v132_v33 = vand.u32 2147483647, %v122_v27  ;;  %vm128_vm5 = vweird.f32 %v122_v27 }
 0x199   :  { %v135_v35 = vor.u32 1.1754944e-38, %v134_v31  ;;  %vm133_vm7 = vcmp.eq.f32.partialorder %v132_v33, 8.507059e+37 }
 0x19d   :  { %v194_v28 = vpop.eup %193 }
 0x19e   :  { %v124_v29 = vmul.f32 %v194_v28, %v122_v27  ;;  %vm129_vm4 = vweird.f32 %v194_v28 }
 0x19f   :  { %vm130_vm6 = vmor %vm128_vm5, %vm129_vm4 }
 0x1a0   :  { %v125_v30 = vsub.f32 1.0, %v124_v29 }
 0x1a2   :  { %v126_v32 = vmul.f32 %v194_v28, %v125_v30 }
 0x1a4   :  { %v127_v34 = vadd.f32 %v194_v28, %v126_v32 }
 0x1a6   :  { %v131_v36 = vsel %vm130_vm6, %v194_v28, %v127_v34 }
 0x1a7   :  { %v136_v37 = vsel %vm133_vm7, %v135_v35, %v131_v36 }
 0x1a8   :  { %v138_v38 = vperm.slane %v136_v37, 0  ;;  %v145_v39 = vperm.slane %v136_v37, 1 }
 0x1aa   :  { %143 = vperm.xlu1 %187, %v138_v38  }
 0x1b2   :  { %150 = vperm.xlu1 %187, %v145_v39  }
 0x21c   :  { %v144_v40 = vpop.permute.xlu1 %143 }
 0x21d   :  { %v152_v41 = vmul.f32 %v144_v40, %v37_v0  ;;  %v153_v42 = vmul.f32 %v144_v40, %v38_v1 }
 0x21f   :  { %156 = vst [vmem:[#allocation5] sm:$0xff] %v152_v41 }
 0x220   :  { %157 = vst [vmem:[#allocation5 + $0x8] sm:$0xff] %v153_v42 }
 0x224   :  { %v151_v43 = vpop.permute.xlu1 %150 }
 0x225   :  { %v154_v44 = vmul.f32 %v151_v43, %v287_v3  ;;  %v155_v45 = vmul.f32 %v151_v43, %v289_v4 }
 0x227   :  { %158 = vst [vmem:[#allocation5 + $0x10] sm:$0xff] %v154_v44 }
 0x228   :  { %159 = vst [vmem:[#allocation5 + $0x18] sm:$0xff] %v155_v45 }
 0x229   :  { %172 = dma.vmem_to_hbm [thread:$0]  %s165_s3, 512, %s167_s7, [#allocation4], %s248_s23, %s248_s23, %s249_s24  }
 0x22a   :  { %245 = dma.done.wait [#allocation4], 512  }
 0x22b   :  { %246 = vsyncadd [#allocation4], 4294966784 }
 0x22c   :  { %177 = vsyncpa [#allocation3], 1 }
 0x22d   :  { %178 = vsyncpa [#allocation4], 1 }

</bundles_post_ra>
